<compile_context>
chip_gen: v5e
topology: v5e:2x2
jax: 0.10.0
libtpu: 0.0.40
codegen_flags: <defaults>
</compile_context>

<pallas_src>
import jax
import jax.numpy as jnp
from jax.experimental import pallas as pl
from jax.experimental.pallas import tpu as pltpu


# ------------------------------ fused kernel ------------------------------ #

def _make_fused_kernel(layer_meta, W, matmul_dtype):
    """layer_meta: per-block static dict with dims, shifts and slab offsets."""

    def kernel(x_ref, mask_ref, slab_ref, o_ref):
        S = slab_ref[...]                      # (R, 128) f32 weight/bias slab
        mask = mask_ref[...]                   # (1, W): 1.0 data cols, 0.0 pad
        h = x_ref[0]                           # (c_in0, W) f32; pad cols zero
        for m in layer_meta:
            c_in, c_out = m["c_in"], m["c_out"]
            rows1, has_ds = m["rows1"], m["has_ds"]
            shifts = m["shifts"]
            mask_b = jnp.broadcast_to(mask, (c_out, W))   # hoisted, reused 2x

            def conv(act, w_offs, b_off, nrows, ncols):
                # K-tap dilated conv = K tiny MXU matmuls accumulated in f32.
                acc = None
                for off, s in zip(w_offs, shifts):
                    a = act if s == 0 else pltpu.roll(act, shift=s, axis=1)
                    wk = S[off:off + nrows, :ncols].astype(matmul_dtype)
                    p = jnp.dot(wk, a.astype(matmul_dtype),
                                preferred_element_type=jnp.float32)
                    acc = p if acc is None else acc + p
                return acc + S[b_off:b_off + nrows, 0:1]

            # conv1 (+ fused 1x1 downsample rows) -> relu1 -> re-zero pad cols
            a1 = conv(h, m["w1_offs"], m["b1_off"], rows1, c_in)
            h1 = jnp.maximum(a1[:c_out], 0.0) * mask_b
            res = a1[c_out:] if has_ds else h            # residual (pad cols 0
                                                         # only for identity)
            # TODO(synk): nn.Dropout(0.2) is identity at inference; training-
            #             mode dropout is not implemented here.
            # conv2 -> relu2 -> +residual -> block relu -> re-zero pad cols
            a2 = conv(h1, m["w2_offs"], m["b2_off"], c_out, c_out)
            h = jnp.maximum(jnp.maximum(a2, 0.0) + res, 0.0) * mask_b

        o_ref[0] = h

    return kernel


# ------------------------------ host helpers ------------------------------- #

def _round_up(v, m):
    return ((v + m - 1) // m) * m


def _device_kind():
    try:
        return jax.devices()[0].device_kind.lower()
    except Exception:
        return ""


def default_matmul_dtype():
    kind = _device_kind()
    # v6e / v7x MXUs are natively bf16; f32 matmul is multi-pass emulation.
    if "v6" in kind or "v7" in kind:
        return jnp.bfloat16
    return jnp.float32


def _default_batch_tile(N):
    kind = _device_kind()
    if "v7" in kind:                # 2 TensorCores: keep an even grid >= 2
        if N % 4 == 0 and N >= 8:
            return N // 4
        if N % 2 == 0:
            return N // 2
    return N                        # single TC: fold whole batch into lanes


# ------------------------------ host wrapper ------------------------------- #

def temporal_conv_net(x, params, *, kernel_size=2, batch_tile=None,
                      matmul_dtype=None):
    """x: (N, C_in, L).  params: list of
       (w1 (c_out,c_in,K), b1 (c_out,), w2 (c_out,c_out,K), b2 (c_out,),
        wd (c_out,c_in) or None, bd (c_out,) or None)."""
    N, C0, L = x.shape
    K = kernel_size
    n_layers = len(params)
    P = (K - 1) * (2 ** (n_layers - 1))      # deepest layer's causal padding
    Lp = L + P

    if matmul_dtype is None:
        matmul_dtype = default_matmul_dtype()
    if batch_tile is None:
        batch_tile = _default_batch_tile(N)
    assert N % batch_tile == 0, "batch must be divisible by batch_tile"
    G = N // batch_tile
    Wraw = batch_tile * Lp
    W = _round_up(Wraw, 128)                 # lane-dense blocks / full stores

    # layout prep: fold batch into lanes, per-segment causal left pad, then a
    # trailing zero pad up to the 128-aligned lane width.
    xf = x.reshape(G, batch_tile, C0, L).transpose(0, 2, 1, 3)    # (G,C0,B,L)
    xf = jnp.pad(xf, ((0, 0), (0, 0), (0, 0), (P, 0))).reshape(G, C0, Wraw)
    xf = jnp.pad(xf, ((0, 0), (0, 0), (0, W - Wraw))).astype(jnp.float32)

    seg = jnp.concatenate([jnp.zeros((1, P), jnp.float32),
                           jnp.ones((1, L), jnp.float32)], axis=1)
    mask = jnp.pad(jnp.tile(seg, (1, batch_tile)),
                   ((0, 0), (0, W - Wraw)))                        # (1, W)

    # pack every layer's weights & biases into one (R, 128-lane) f32 slab
    max_c = max([C0] + [w1.shape[0] for (w1, *_rest) in params])
    C_slab = _round_up(max_c, 128)
    blocks, layer_meta = [], []
    r = 0
    c_in = C0

    def add_block(blk):
        nonlocal r
        nrows = blk.shape[0]
        rpad = _round_up(nrows, 8)
        if rpad != nrows:
            blk = jnp.pad(blk, ((0, rpad - nrows), (0, 0)))
        off = r
        blocks.append(blk)
        r += rpad
        return off

    for i, (w1, b1, w2, b2, wd, bd) in enumerate(params):
        c_out = w1.shape[0]
        d = 2 ** i
        has_ds = wd is not None
        assert w1.shape == (c_out, c_in, K) and w2.shape == (c_out, c_out, K)
        assert has_ds == (c_in != c_out)
        shifts = tuple((K - 1 - k) * d for k in range(K))
        rows1 = 2 * c_out if has_ds else c_out

        w1_offs = []
        for k in range(K):
            blk = jnp.zeros((rows1, C_slab), jnp.float32)
            blk = blk.at[:c_out, :c_in].set(w1[:, :, k])
            if has_ds and shifts[k] == 0:    # fuse 1x1 downsample: extra rows
                blk = blk.at[c_out:, :c_in].set(wd)
            w1_offs.append(add_block(blk))
        bblk = jnp.zeros((rows1, C_slab), jnp.float32).at[:c_out, 0].set(b1)
        if has_ds:
            bblk = bblk.at[c_out:, 0].set(bd)
        b1_off = add_block(bblk)

        w2_offs = []
        for k in range(K):
            blk = jnp.zeros((c_out, C_slab), jnp.float32)
            w2_offs.append(add_block(blk.at[:, :c_out].set(w2[:, :, k])))
        b2_off = add_block(
            jnp.zeros((c_out, C_slab), jnp.float32).at[:, 0].set(b2))

        layer_meta.append(dict(c_in=c_in, c_out=c_out, rows1=rows1,
                               has_ds=has_ds, shifts=shifts,
                               w1_offs=tuple(w1_offs), b1_off=b1_off,
                               w2_offs=tuple(w2_offs), b2_off=b2_off))
        c_in = c_out

    slab = jnp.concatenate(blocks, axis=0)            # (R, C_slab) f32
    c_last = c_in

    kernel = _make_fused_kernel(tuple(layer_meta), W, matmul_dtype)
    yf = pl.pallas_call(
        kernel,
        out_shape=jax.ShapeDtypeStruct((G, c_last, W), jnp.float32),
        grid_spec=pltpu.PrefetchScalarGridSpec(
            num_scalar_prefetch=0,
            grid=(G,),
            in_specs=[pl.BlockSpec((1, C0, W), lambda g: (g, 0, 0)),
                      pl.BlockSpec((1, W), lambda g: (0, 0)),
                      pl.BlockSpec(slab.shape, lambda g: (0, 0))],
            out_specs=pl.BlockSpec((1, c_last, W), lambda g: (g, 0, 0)),
        ),
        compiler_params=pltpu.CompilerParams(
            dimension_semantics=("parallel",)),
    )(xf, mask, slab)

    # unpack: drop trailing lane pad, drop per-segment causal pad, unfold batch
    y = yf[:, :, :Wraw].reshape(G, c_last, batch_tile, Lp)[:, :, :, P:]
    return y.transpose(0, 2, 1, 3).reshape(N, c_last, L)


# -------------------------- parameter construction ------------------------- #

def weight_norm_effective(v, g):
    # PyTorch weight_norm (dim=0): w = g * v / ||v||, norm over (in, k) per out.
    norm = jnp.sqrt(jnp.sum(v * v, axis=(1, 2), keepdims=True))
    return g[:, None, None] * v / norm


def init_tcn_params(key, num_inputs, num_channels, K):
    params = []
    c_in = num_inputs
    for c_out in num_channels:
        key, *ks = jax.random.split(key, 9)
        v1 = 0.01 * jax.random.normal(ks[0], (c_out, c_in, K), jnp.float32)
        g1 = 0.5 + jax.random.uniform(ks[1], (c_out,), jnp.float32)
        w1 = weight_norm_effective(v1, g1)
        b1 = 0.1 * jax.random.normal(ks[2], (c_out,), jnp.float32)
        v2 = 0.01 * jax.random.normal(ks[3], (c_out, c_out, K), jnp.float32)
        g2 = 0.5 + jax.random.uniform(ks[4], (c_out,), jnp.float32)
        w2 = weight_norm_effective(v2, g2)
        b2 = 0.1 * jax.random.normal(ks[5], (c_out,), jnp.float32)
        if c_in != c_out:
            wd = 0.01 * jax.random.normal(ks[6], (c_out, c_in), jnp.float32)
            bd = 0.1 * jax.random.normal(ks[7], (c_out,), jnp.float32)
        else:
            wd, bd = None, None
        params.append((w1, b1, w2, b2, wd, bd))
        c_in = c_out
    return params


# ------------------------------ pure-JAX ref -------------------------------- #

def ref_tcn(x, params, K=2, matmul_dtype=jnp.float32):
    """Reference with the same matmul-input precision as the kernel."""
    def mm(a):
        return a.astype(matmul_dtype).astype(jnp.float32)

    out = x.astype(jnp.float32)
    for i, (w1, b1, w2, b2, wd, bd) in enumerate(params):
        d = 2 ** i
        p = (K - 1) * d
        L = out.shape[-1]

        def causal_conv(inp, w, b):
            ip = jnp.pad(mm(inp), ((0, 0), (0, 0), (p, 0)))
            acc = jnp.zeros((inp.shape[0], w.shape[0], L), jnp.float32)
            for k in range(K):
                acc = acc + jnp.einsum('oc,ncl->nol', mm(w[:, :, k]),
                                       ip[:, :, k * d:k * d + L])
            return acc + b[None, :, None]

        out1 = jax.nn.relu(causal_conv(out, w1, b1))
        out2 = jax.nn.relu(causal_conv(out1, w2, b2))
        res = out if wd is None else (jnp.einsum('oc,ncl->nol', mm(wd), mm(out))
                                      + bd[None, :, None])
        out = jax.nn.relu(out2 + res)
    return out


# ---------------------------------- main ------------------------------------ #

if __name__ == "__main__":
    key = jax.random.PRNGKey(0)
    N, num_inputs, L = 4, 4, 16
    num_channels = (8, 8)     # layer0: 4->8 (downsample), layer1: identity res
    kernel_size = 2

    kx, kp = jax.random.split(key)
    x = jax.random.normal(kx, (N, num_inputs, L), jnp.float32)
    params = init_tcn_params(kp, num_inputs, num_channels, kernel_size)

    mm_dtype = default_matmul_dtype()          # bf16 on v6e/v7x, f32 otherwise
    out = temporal_conv_net(x, params, kernel_size=kernel_size,
                            matmul_dtype=mm_dtype)
    out = jax.block_until_ready(out)

    ref = jax.block_until_ready(
        ref_tcn(x, params, K=kernel_size, matmul_dtype=mm_dtype))
    assert out.shape == (N, num_channels[-1], L)
    tol = 5e-3 if mm_dtype == jnp.bfloat16 else 1e-4
    max_err = float(jnp.max(jnp.abs(out - ref)))
    assert max_err < tol, f"mismatch vs reference: {max_err}"

    print("KERNEL_OK")
</pallas_src>

<mosaic_0001>
module attributes {stable_mosaic.version = 11 : i64} {
  func.func @kernel(%arg0: i32, %arg1: memref<1x4x128xf32, #tpu.memory_space<vmem>>, %arg2: memref<1x128xf32, #tpu.memory_space<vmem>>, %arg3: memref<120x128xf32, #tpu.memory_space<vmem>>, %arg4: memref<1x8x128xf32, #tpu.memory_space<vmem>>) attributes {dimension_semantics = [#tpu.dimension_semantics<parallel>], iteration_bounds = array<i64: 1>, scalar_prefetch = 0 : i64, scratch_operands = 0 : i64, tpu.core_type = #tpu.core_type<tc>, window_params = [{transform_indices = @transform_0, window_bounds = array<i64: 1, 4, 128>}, {pipeline_mode = #tpu.pipeline_mode<synchronous>, transform_indices = @transform_1, window_bounds = array<i64: 1, 128>}, {pipeline_mode = #tpu.pipeline_mode<synchronous>, transform_indices = @transform_2, window_bounds = array<i64: 120, 128>}, {transform_indices = @transform_3, window_bounds = array<i64: 1, 8, 128>}]} {
    %c0 = arith.constant 0 : index
    %c0_0 = arith.constant 0 : index
    %0 = vector.load %arg3[%c0, %c0_0] : memref<120x128xf32, #tpu.memory_space<vmem>>, vector<120x128xf32>
    %c0_1 = arith.constant 0 : index
    %c0_2 = arith.constant 0 : index
    %1 = vector.load %arg2[%c0_1, %c0_2] : memref<1x128xf32, #tpu.memory_space<vmem>>, vector<1x128xf32>
    %c0_3 = arith.constant 0 : index
    %c0_4 = arith.constant 0 : index
    %c0_5 = arith.constant 0 : index
    %2 = vector.load %arg1[%c0_3, %c0_4, %c0_5] : memref<1x4x128xf32, #tpu.memory_space<vmem>>, vector<1x4x128xf32>
    %3 = vector.shape_cast %2 : vector<1x4x128xf32> to vector<4x128xf32>
    %4 = vector.shape_cast %1 : vector<1x128xf32> to vector<1x128xf32>
    %5 = vector.broadcast %4 : vector<1x128xf32> to vector<8x128xf32>
    %c1_i32 = arith.constant 1 : i32
    %6 = tpu.dynamic_rotate %3 by %c1_i32 dim 1 : vector<4x128xf32>, i32 -> vector<4x128xf32>
    %7 = vector.extract_strided_slice %0 {offsets = [0, 0], sizes = [16, 4], strides = [1, 1]} : vector<120x128xf32> to vector<16x4xf32>
    %cst = arith.constant dense<0.000000e+00> : vector<16x128xf32>
    %8 = tpu.matmul %7, %6, %cst {dimension_numbers = #tpu.dot_dimension_numbers<[1], [0], [0], [1], [0, 0, 1, 1], [], []>} : vector<16x4xf32>, vector<4x128xf32>, vector<16x128xf32> -> vector<16x128xf32>
    %9 = vector.extract_strided_slice %0 {offsets = [16, 0], sizes = [16, 4], strides = [1, 1]} : vector<120x128xf32> to vector<16x4xf32>
    %cst_6 = arith.constant dense<0.000000e+00> : vector<16x128xf32>
    %10 = tpu.matmul %9, %3, %cst_6 {dimension_numbers = #tpu.dot_dimension_numbers<[1], [0], [0], [1], [0, 0, 1, 1], [], []>} : vector<16x4xf32>, vector<4x128xf32>, vector<16x128xf32> -> vector<16x128xf32>
    %11 = arith.addf %8, %10 : vector<16x128xf32>
    %12 = vector.extract_strided_slice %0 {offsets = [32, 0], sizes = [16, 1], strides = [1, 1]} : vector<120x128xf32> to vector<16x1xf32>
    %13 = vector.broadcast %12 : vector<16x1xf32> to vector<16x128xf32>
    %14 = arith.addf %11, %13 : vector<16x128xf32>
    %15 = vector.extract_strided_slice %14 {offsets = [0, 0], sizes = [8, 128], strides = [1, 1]} : vector<16x128xf32> to vector<8x128xf32>
    %cst_7 = arith.constant 0.000000e+00 : f32
    %16 = vector.broadcast %cst_7 : f32 to vector<8x128xf32>
    %17 = arith.maximumf %15, %16 : vector<8x128xf32>
    %18 = arith.mulf %17, %5 : vector<8x128xf32>
    %19 = vector.extract_strided_slice %14 {offsets = [8, 0], sizes = [8, 128], strides = [1, 1]} : vector<16x128xf32> to vector<8x128xf32>
    %c1_i32_8 = arith.constant 1 : i32
    %20 = tpu.dynamic_rotate %18 by %c1_i32_8 dim 1 : vector<8x128xf32>, i32 -> vector<8x128xf32>
    %21 = vector.extract_strided_slice %0 {offsets = [48, 0], sizes = [8, 8], strides = [1, 1]} : vector<120x128xf32> to vector<8x8xf32>
    %cst_9 = arith.constant dense<0.000000e+00> : vector<8x128xf32>
    %22 = tpu.matmul %21, %20, %cst_9 {dimension_numbers = #tpu.dot_dimension_numbers<[1], [0], [0], [1], [0, 0, 1, 1], [], []>} : vector<8x8xf32>, vector<8x128xf32>, vector<8x128xf32> -> vector<8x128xf32>
    %23 = vector.extract_strided_slice %0 {offsets = [56, 0], sizes = [8, 8], strides = [1, 1]} : vector<120x128xf32> to vector<8x8xf32>
    %cst_10 = arith.constant dense<0.000000e+00> : vector<8x128xf32>
    %24 = tpu.matmul %23, %18, %cst_10 {dimension_numbers = #tpu.dot_dimension_numbers<[1], [0], [0], [1], [0, 0, 1, 1], [], []>} : vector<8x8xf32>, vector<8x128xf32>, vector<8x128xf32> -> vector<8x128xf32>
    %25 = arith.addf %22, %24 : vector<8x128xf32>
    %26 = vector.extract_strided_slice %0 {offsets = [64, 0], sizes = [8, 1], strides = [1, 1]} : vector<120x128xf32> to vector<8x1xf32>
    %27 = vector.broadcast %26 : vector<8x1xf32> to vector<8x128xf32>
    %28 = arith.addf %25, %27 : vector<8x128xf32>
    %cst_11 = arith.constant 0.000000e+00 : f32
    %29 = vector.broadcast %cst_11 : f32 to vector<8x128xf32>
    %30 = arith.maximumf %28, %29 : vector<8x128xf32>
    %31 = arith.addf %30, %19 : vector<8x128xf32>
    %cst_12 = arith.constant 0.000000e+00 : f32
    %32 = vector.broadcast %cst_12 : f32 to vector<8x128xf32>
    %33 = arith.maximumf %31, %32 : vector<8x128xf32>
    %34 = arith.mulf %33, %5 : vector<8x128xf32>
    %35 = vector.shape_cast %1 : vector<1x128xf32> to vector<1x128xf32>
    %36 = vector.broadcast %35 : vector<1x128xf32> to vector<8x128xf32>
    %c2_i32 = arith.constant 2 : i32
    %37 = tpu.dynamic_rotate %34 by %c2_i32 dim 1 : vector<8x128xf32>, i32 -> vector<8x128xf32>
    %38 = vector.extract_strided_slice %0 {offsets = [72, 0], sizes = [8, 8], strides = [1, 1]} : vector<120x128xf32> to vector<8x8xf32>
    %cst_13 = arith.constant dense<0.000000e+00> : vector<8x128xf32>
    %39 = tpu.matmul %38, %37, %cst_13 {dimension_numbers = #tpu.dot_dimension_numbers<[1], [0], [0], [1], [0, 0, 1, 1], [], []>} : vector<8x8xf32>, vector<8x128xf32>, vector<8x128xf32> -> vector<8x128xf32>
    %40 = vector.extract_strided_slice %0 {offsets = [80, 0], sizes = [8, 8], strides = [1, 1]} : vector<120x128xf32> to vector<8x8xf32>
    %cst_14 = arith.constant dense<0.000000e+00> : vector<8x128xf32>
    %41 = tpu.matmul %40, %34, %cst_14 {dimension_numbers = #tpu.dot_dimension_numbers<[1], [0], [0], [1], [0, 0, 1, 1], [], []>} : vector<8x8xf32>, vector<8x128xf32>, vector<8x128xf32> -> vector<8x128xf32>
    %42 = arith.addf %39, %41 : vector<8x128xf32>
    %43 = vector.extract_strided_slice %0 {offsets = [88, 0], sizes = [8, 1], strides = [1, 1]} : vector<120x128xf32> to vector<8x1xf32>
    %44 = vector.broadcast %43 : vector<8x1xf32> to vector<8x128xf32>
    %45 = arith.addf %42, %44 : vector<8x128xf32>
    %cst_15 = arith.constant 0.000000e+00 : f32
    %46 = vector.broadcast %cst_15 : f32 to vector<8x128xf32>
    %47 = arith.maximumf %45, %46 : vector<8x128xf32>
    %48 = arith.mulf %47, %36 : vector<8x128xf32>
    %c2_i32_16 = arith.constant 2 : i32
    %49 = tpu.dynamic_rotate %48 by %c2_i32_16 dim 1 : vector<8x128xf32>, i32 -> vector<8x128xf32>
    %50 = vector.extract_strided_slice %0 {offsets = [96, 0], sizes = [8, 8], strides = [1, 1]} : vector<120x128xf32> to vector<8x8xf32>
    %cst_17 = arith.constant dense<0.000000e+00> : vector<8x128xf32>
    %51 = tpu.matmul %50, %49, %cst_17 {dimension_numbers = #tpu.dot_dimension_numbers<[1], [0], [0], [1], [0, 0, 1, 1], [], []>} : vector<8x8xf32>, vector<8x128xf32>, vector<8x128xf32> -> vector<8x128xf32>
    %52 = vector.extract_strided_slice %0 {offsets = [104, 0], sizes = [8, 8], strides = [1, 1]} : vector<120x128xf32> to vector<8x8xf32>
    %cst_18 = arith.constant dense<0.000000e+00> : vector<8x128xf32>
    %53 = tpu.matmul %52, %48, %cst_18 {dimension_numbers = #tpu.dot_dimension_numbers<[1], [0], [0], [1], [0, 0, 1, 1], [], []>} : vector<8x8xf32>, vector<8x128xf32>, vector<8x128xf32> -> vector<8x128xf32>
    %54 = arith.addf %51, %53 : vector<8x128xf32>
    %55 = vector.extract_strided_slice %0 {offsets = [112, 0], sizes = [8, 1], strides = [1, 1]} : vector<120x128xf32> to vector<8x1xf32>
    %56 = vector.broadcast %55 : vector<8x1xf32> to vector<8x128xf32>
    %57 = arith.addf %54, %56 : vector<8x128xf32>
    %cst_19 = arith.constant 0.000000e+00 : f32
    %58 = vector.broadcast %cst_19 : f32 to vector<8x128xf32>
    %59 = arith.maximumf %57, %58 : vector<8x128xf32>
    %60 = arith.addf %59, %34 : vector<8x128xf32>
    %cst_20 = arith.constant 0.000000e+00 : f32
    %61 = vector.broadcast %cst_20 : f32 to vector<8x128xf32>
    %62 = arith.maximumf %60, %61 : vector<8x128xf32>
    %63 = arith.mulf %62, %36 : vector<8x128xf32>
    %c0_21 = arith.constant 0 : index
    %c0_22 = arith.constant 0 : index
    %c0_23 = arith.constant 0 : index
    %64 = vector.load %arg4[%c0_21, %c0_22, %c0_23] : memref<1x8x128xf32, #tpu.memory_space<vmem>>, vector<1x8x128xf32>
    %65 = vector.shape_cast %64 : vector<1x8x128xf32> to vector<8x128xf32>
    %66 = vector.shape_cast %63 : vector<8x128xf32> to vector<1x8x128xf32>
    tpu.vector_store %arg4[%c0_21, %c0_22, %c0_23], %66 {strides = array<i32>} : memref<1x8x128xf32, #tpu.memory_space<vmem>>, vector<1x8x128xf32>,
    return
  }
  func.func @transform_0(%arg0: i32) -> (i32, i32, i32) {
    %c0_i32 = arith.constant 0 : i32
    %c0_i32_0 = arith.constant 0 : i32
    %c0_i32_1 = arith.constant 0 : i32
    return %arg0, %c0_i32, %c0_i32_0 : i32, i32, i32
  }
  func.func @transform_1(%arg0: i32) -> (i32, i32) {
    %c0_i32 = arith.constant 0 : i32
    %c0_i32_0 = arith.constant 0 : i32
    %c0_i32_1 = arith.constant 0 : i32
    return %c0_i32, %c0_i32_0 : i32, i32
  }
  func.func @transform_2(%arg0: i32) -> (i32, i32) {
    %c0_i32 = arith.constant 0 : i32
    %c0_i32_0 = arith.constant 0 : i32
    %c0_i32_1 = arith.constant 0 : i32
    return %c0_i32, %c0_i32_0 : i32, i32
  }
  func.func @transform_3(%arg0: i32) -> (i32, i32, i32) {
    %c0_i32 = arith.constant 0 : i32
    %c0_i32_0 = arith.constant 0 : i32
    %c0_i32_1 = arith.constant 0 : i32
    return %arg0, %c0_i32, %c0_i32_0 : i32, i32, i32
  }
}

</mosaic_0001>

<bundles_post_ra>
// kernel: tpu_custom_call.1
= control target key start
LH: loop header
LB: loop body
LE: loop exit
PB: predicated region body
PF: predicated region fallthrough
CT: control target
= control target key end

     0   :  { %8 = vsyncpa [#allocation3], 0  ;;  %s536_s0 = inlined_call_operand.hbm [shape: f32[1,4,128], index: 0, kind: input, shape index: {}]   ;;  %s537_s1 = inlined_call_operand.hbm [shape: f32[1,128], index: 1, kind: input, shape index: {}]   ;;  %s538_s2 = inlined_call_operand.hbm [shape: f32[120,128], index: 2, kind: input, shape index: {}]   ;;  %s539_s3 = inlined_call_operand.hbm [shape: f32[1,8,128], index: 3, kind: output, shape index: {}]  }
   0x1   :  { %9 = vsyncpa [#allocation6], 0  ;;  %s27_s14 = sshll.u32 %s537_s1, 4  ;;  %s28_s14 = int_to_ptr.hbm [resolvable:$true] %s27_s14 }
   0x2   :  { %10 = vsyncpa [#allocation4], 0  ;;  %s479_s15 = smov [#allocation5]   ;;  %s16_s19 = sshll.u32 %s536_s0, 4  ;;  %s17_s19 = int_to_ptr.hbm [resolvable:$true] %s16_s19 }
   0x3   :  { %s29_s16 = sshll.u32 %s479_s15, 4  ;;  %s480_s20 = smov [#allocation2]   ;;  %s30_s16 = int_to_ptr.vmem [resolvable:$true] %s29_s16 }
   0x4   :  { %32 = dma.hbm_to_vmem [thread:$0]  %s28_s14, 16, %s30_s16, [#allocation6]  }
   0x5   :  { %s18_s21 = sshll.u32 %s480_s20, 4  ;;  %s37_s24 = sshll.u32 %s538_s2, 4  ;;  %s19_s21 = int_to_ptr.vmem [resolvable:$true] %s18_s21  ;;  %s38_s24 = int_to_ptr.hbm [resolvable:$true] %s37_s24 }
   0x6   :  { %21 = dma.hbm_to_vmem [thread:$0]  %s17_s19, 64, %s19_s21, [#allocation3]  }
   0x7   :  { %s481_s1 = smov [#allocation7]   ;;  %s482_s26 = smov 128  }
   0x8   :  { %s39_s25 = sshll.u32 %s481_s1, 4  ;;  %s483_s27 = smov 8   ;;  %s40_s25 = int_to_ptr.vmem [resolvable:$true] %s39_s25 }
   0x9   :  { %45 = dma.hbm_to_vmem [thread:$0]  %s38_s24, 1920, %s40_s25, [#allocation6], %s482_s26, %s482_s26, %s483_s27  }
   0xa   :  { %473 = dma.done.wait [#allocation3], 64  }
   0xb   :  { %474 = vsyncadd [#allocation3], 4294967232 }
   0xc   :  { %475 = dma.done.wait [#allocation6], 1936  }
   0xd   :  { %476 = vsyncadd [#allocation6], 4294965360  ;;  %v74_v0 = vld [vmem:[#allocation2] sm:$0xf]  ;;  %s484_s0 = smov 1   ;;  %vm87_vm0 = vcmask 1043456  }
   0xe   :  { %78 = vrot.lane.b32.xlu0 %v74_v0, %s484_s0  ;;  %352 = vmatpush.msk.msra.mxu0 %vm87_vm0, %v74_v0  ;;  %v60_v1 = vld [vmem:[#allocation7 + $0x10] sm:$0xff]  ;;  %vm80_vm1 = vcmask 31744   ;;  %v62_v2 = vld [vmem:[#allocation7 + $0x20] sm:$0xff]  ;;  %v485_v3 = vmov 0   ;;  %v519_v12 = vld [vmem:[#allocation5] ss:$0 sm:$0xff] }
   0xf   :  { %353 = vmatmul.msk.f32.vlgmr.msra.gmra.mxu0 %vm80_vm1, %v60_v1  ;;  %373 = vset.pattern.permute.xlu0 %v485_v3  ;;  %v72_v4 = vld [vmem:[#allocation7 + $0x70] sm:$0xff]  ;;  %v58_v5 = vld [vmem:[#allocation7] sm:$0xff]  ;;  %v65_v15 = vld [vmem:[#allocation7 + $0x38] sm:$0xff]  ;;  %vm162_vm2 = vcmask 64512   ;;  %s486_s2 = smov 2   ;;  %s487_s28 = smov [#allocation8]  }
  0x10   :  { %374 = vset.pattern.permute.xlu1 %v485_v3  ;;  %375 = vset.pattern.permute.xlu2 %v485_v3  ;;  %v61_v16 = vld [vmem:[#allocation7 + $0x18] sm:$0xff]  ;;  %v59_v17 = vld [vmem:[#allocation7 + $0x8] sm:$0xff]  ;;  %v66_v18 = vld [vmem:[#allocation7 + $0x40] sm:$0xff]  ;;  %s339_s29 = sshll.u32 %s487_s28, 4  ;;  %s341_s5 = sshll.u32 %s539_s3, 4  ;;  %s340_s29 = int_to_ptr.vmem [resolvable:$true] %s339_s29  ;;  %s342_s5 = int_to_ptr.hbm [resolvable:$true] %s341_s5 }
  0x11   :  { %v63_v19 = vld [vmem:[#allocation7 + $0x28] sm:$0xff]  ;;  %v69_v20 = vld [vmem:[#allocation7 + $0x58] sm:$0xff]  ;;  %v64_v21 = vld [vmem:[#allocation7 + $0x30] sm:$0xff] }
  0x12   :  { %153 = vperm.xlu2 %375, %v63_v19   ;;  %v68_v37 = vld [vmem:[#allocation7 + $0x50] sm:$0xff]  ;;  %v67_v38 = vld [vmem:[#allocation7 + $0x48] sm:$0xff]  ;;  %v70_v48 = vld [vmem:[#allocation7 + $0x60] sm:$0xff] }
  0x13   :  { %v71_v47 = vld [vmem:[#allocation7 + $0x68] sm:$0xff] }
  0x16   :  { %148 = vperm.xlu0 %373, %v62_v2  }
  0x17   :  { %354 = vmatmul.msk.f32.gmra.mxu0 %vm80_vm1, %v61_v16 }
  0x1e   :  { %325 = vperm.xlu0 %373, %v72_v4  }
  0x6c   :  { %v154_v28 = vpop.permute.xlu2 %153 }
  0x80   :  { %v79_v6 = vpop.permute.xlu0 %78 }
  0x81   :  { %355 = vmatpush.msk.msra.mxu1 %vm87_vm0, %v79_v6 }
  0x82   :  { %356 = vmatmul.msk.f32.vlgmr.msra.gmra.mxu1 %vm80_vm1, %v58_v5 }
  0x88   :  { %v149_v10 = vpop.permute.xlu0 %148 }
  0x8a   :  { %357 = vmatmul.msk.f32.gmra.mxu1 %vm80_vm1, %v59_v17 }
  0x8c   :  { %v108_v7 = vpop.f32.mrf.mxu0 }
  0x90   :  { %v326_v53 = vpop.permute.xlu0 %325 }
  0x94   :  { %v111_v23 = vpop.f32.mrf.mxu0 }
  0xff   :  { %v140_v8 = vpop.f32.mrf.mxu1 }
 0x100   :  { %v141_v9 = vadd.f32 %v140_v8, %v108_v7 }
 0x102   :  { %v156_v11 = vadd.f32 %v149_v10, %v141_v9 }
 0x104   :  { %v158_v13 = vmax.f32 %v156_v11, 0.0 }
 0x106   :  { %v159_v14 = vmul.f32 %v519_v12, %v158_v13 }
 0x107   :  { %v143_v24 = vpop.f32.mrf.mxu1 }
 0x108   :  { %160 = vrot.lane.b32.xlu1 %v159_v14, %s484_s0  ;;  %181 = vmatpush.msra.mxu2 %v159_v14  ;;  %v144_v26 = vadd.f32 %v143_v24, %v111_v23 }
 0x109   :  { %358 = vmatmul.msk.f32.vlgmr.msra.gmra.mxu2 %vm162_vm2, %v65_v15 }
 0x10a   :  { %v157_v32 = vadd.f32 %v154_v28, %v144_v26 }
 0x110   :  { %211 = vperm.xlu1 %374, %v66_v18  }
 0x118   :  { %269 = vperm.xlu1 %374, %v69_v20  }
 0x17a   :  { %v161_v22 = vpop.permute.xlu1 %160 }
 0x17b   :  { %204 = vmatpush.msra.mxu3 %v161_v22 }
 0x17c   :  { %359 = vmatmul.msk.f32.vlgmr.msra.gmra.mxu3 %vm162_vm2, %v64_v21 }
 0x182   :  { %v212_v30 = vpop.permute.xlu1 %211 }
 0x18a   :  { %v270_v43 = vpop.permute.xlu1 %269 }
 0x18c   :  { %v183_v25 = vpop.f32.mrf.mxu2 }
 0x1ff   :  { %v206_v27 = vpop.f32.mrf.mxu3 }
 0x200   :  { %v207_v29 = vadd.f32 %v206_v27, %v183_v25 }
 0x202   :  { %v214_v31 = vadd.f32 %v212_v30, %v207_v29 }
 0x204   :  { %v215_v33 = vmax.f32 %v214_v31, 0.0 }
 0x206   :  { %v216_v34 = vadd.f32 %v215_v33, %v157_v32 }
 0x208   :  { %v217_v35 = vmax.f32 %v216_v34, 0.0 }
 0x20a   :  { %v218_v36 = vmul.f32 %v519_v12, %v217_v35 }
 0x20c   :  { %219 = vrot.lane.b32.xlu2 %v218_v36, %s486_s2  ;;  %239 = vmatpush.msrb.mxu2 %v218_v36 }
 0x20d   :  { %360 = vmatmul.msk.f32.vlgmr.msrb.gmra.mxu2 %vm162_vm2, %v68_v37 }
 0x266   :  { %v220_v39 = vpop.permute.xlu2 %219 }
 0x267   :  { %262 = vmatpush.msrb.mxu3 %v220_v39 }
 0x268   :  { %361 = vmatmul.msk.f32.vlgmr.msrb.gmra.mxu3 %vm162_vm2, %v67_v38 }
 0x290   :  { %v241_v40 = vpop.f32.mrf.mxu2 }
 0x2eb   :  { %v264_v41 = vpop.f32.mrf.mxu3 }
 0x2ec   :  { %v265_v42 = vadd.f32 %v264_v41, %v241_v40 }
 0x2ee   :  { %v272_v44 = vadd.f32 %v270_v43, %v265_v42 }
 0x2f0   :  { %v273_v45 = vmax.f32 %v272_v44, 0.0 }
 0x2f2   :  { %v274_v46 = vmul.f32 %v519_v12, %v273_v45 }
 0x2f4   :  { %275 = vrot.lane.b32.xlu2 %v274_v46, %s486_s2  ;;  %295 = vmatpush.msrb.mxu0 %v274_v46 }
 0x2f5   :  { %362 = vmatmul.msk.f32.vlgmr.msrb.gmra.mxu0 %vm162_vm2, %v71_v47 }
 0x34e   :  { %v276_v49 = vpop.permute.xlu2 %275 }
 0x34f   :  { %318 = vmatpush.msrb.mxu1 %v276_v49 }
 0x350   :  { %363 = vmatmul.msk.f32.vlgmr.msrb.gmra.mxu1 %vm162_vm2, %v70_v48 }
 0x372   :  { %v297_v50 = vpop.f32.mrf.mxu0 }
 0x3cd   :  { %v320_v51 = vpop.f32.mrf.mxu1 }
 0x3ce   :  { %v321_v52 = vadd.f32 %v320_v51, %v297_v50 }
 0x3d0   :  { %v328_v54 = vadd.f32 %v326_v53, %v321_v52 }
 0x3d2   :  { %v329_v55 = vmax.f32 %v328_v54, 0.0 }
 0x3d4   :  { %v330_v56 = vadd.f32 %v329_v55, %v218_v36 }
 0x3d6   :  { %v331_v57 = vmax.f32 %v330_v56, 0.0 }
 0x3d8   :  { %v332_v58 = vmul.f32 %v519_v12, %v331_v57 }
 0x3da   :  { %333 = vst [vmem:[#allocation8] sm:$0xff] %v332_v58 }
 0x3db   :  { %344 = dma.vmem_to_hbm [thread:$0]  %s340_s29, 128, %s342_s5, [#allocation4]  }
 0x3dc   :  { %477 = dma.done.wait [#allocation4], 128  }
 0x3dd   :  { %478 = vsyncadd [#allocation4], 4294967168 }
 0x3de   :  { %349 = vsyncpa [#allocation3], 1 }
 0x3df   :  { %350 = vsyncpa [#allocation6], 1 }
 0x3e0   :  { %351 = vsyncpa [#allocation4], 1 }

</bundles_post_ra>
